<compile_context>
chip_gen: v7x
topology: tpu7x:2x2x1
jax: 0.10.0
libtpu: 0.0.40
codegen_flags: <defaults>
</compile_context>

<pallas_src>
import functools
import math

import jax
import jax.numpy as jnp
from jax.experimental import pallas as pl
from jax.experimental.pallas import tpu as pltpu

LN_EPS = 1e-5
VMEM_LIMIT_BYTES = 48 * 1024 * 1024   # above v5e/v6e scoped defaults, <= v7x physical


def _compiler_params(*sems):
    return pltpu.CompilerParams(dimension_semantics=tuple(sems),
                                vmem_limit_bytes=VMEM_LIMIT_BYTES)


# --------------------------- fused Q/K/V projection ---------------------------

def _qkv_kernel(x_ref, w_ref, b_ref, q_ref, k_ref, v_ref):
    # x: (TM, D) -> three (TM, D) outputs; x is loaded once and reused.
    x = x_ref[...].astype(jnp.bfloat16)
    for idx, o_ref in enumerate((q_ref, k_ref, v_ref)):
        y = jnp.dot(x, w_ref[idx], preferred_element_type=jnp.float32)
        y = y + b_ref[idx]                       # bias add in f32
        o_ref[...] = y.astype(o_ref.dtype)


def qkv_projection(x2d, w_qkv_t, b_qkv, *, row_tile=1024):
    """w_qkv_t: (3, D, D) bf16 (Q weight pre-scaled); b_qkv: (3, 1, D) f32."""
    M, D = x2d.shape
    tm = min(M, row_tile)
    act_spec = pl.BlockSpec((tm, D), lambda i: (i, 0))
    out_sds = jax.ShapeDtypeStruct((M, D), jnp.bfloat16)
    cost = pl.CostEstimate(
        flops=2 * M * D * 3 * D,
        transcendentals=0,
        bytes_accessed=M * D * 4 + 3 * D * D * 2 + 3 * D * 4 + 3 * M * D * 2)
    return pl.pallas_call(
        _qkv_kernel,
        out_shape=(out_sds, out_sds, out_sds),
        grid=(pl.cdiv(M, tm),),
        in_specs=[
            act_spec,
            pl.BlockSpec((3, D, D), lambda i: (0, 0, 0)),   # resident bf16 weights
            pl.BlockSpec((3, 1, D), lambda i: (0, 0, 0)),
        ],
        out_specs=(act_spec, act_spec, act_spec),
        compiler_params=_compiler_params("parallel"),
        cost_estimate=cost,
    )(x2d, w_qkv_t, b_qkv)


# ------------------------ flash-style attention kernel ------------------------

def _flash_attn_kernel(q_ref, k_ref, v_ref, o_ref, m_sc, l_sc, acc_sc):
    kv = pl.program_id(1)

    @pl.when(kv == 0)
    def _():
        m_sc[...] = jnp.full(m_sc.shape, -jnp.inf, m_sc.dtype)
        l_sc[...] = jnp.zeros(l_sc.shape, l_sc.dtype)
        acc_sc[...] = jnp.zeros(acc_sc.shape, acc_sc.dtype)

    q = q_ref[0]                    # (S, Dh) bf16; 1/sqrt(Dh) folded into W_q
    k = k_ref[0]                    # (TK, Dh) bf16
    v = v_ref[0]                    # (TK, Dh) bf16
    # q @ k^T as an NT contraction -- no explicit transpose op in the kernel.
    s = jax.lax.dot_general(q, k, (((1,), (1,)), ((), ())),
                            preferred_element_type=jnp.float32)      # (S, TK)
    m_new = jnp.maximum(m_sc[...], jnp.max(s, axis=-1, keepdims=True))
    alpha = jnp.exp(m_sc[...] - m_new)
    p = jnp.exp(s - m_new)
    l_sc[...] = alpha * l_sc[...] + jnp.sum(p, axis=-1, keepdims=True)
    acc_sc[...] = alpha * acc_sc[...] + jnp.dot(
        p.astype(jnp.bfloat16), v, preferred_element_type=jnp.float32)
    m_sc[...] = m_new

    @pl.when(kv == pl.num_programs(1) - 1)
    def _():
        inv_l = pl.reciprocal(l_sc[...], approx=True)   # EUP slot; inference-ok
        o_ref[0] = (acc_sc[...] * inv_l).astype(o_ref.dtype)


def flash_attention(q, k, v, *, kv_tile=512):
    """q,k,v: (G, S, Dh) bf16, G = batch*num_head (torch contiguous .view split)."""
    G, S, Dh = q.shape
    tk = min(S, kv_tile)
    if S % tk:
        tk = S   # TODO(synk): mask padded K rows instead of falling back to full S
    cost = pl.CostEstimate(
        flops=4 * G * S * S * Dh,
        transcendentals=G * S * S,
        bytes_accessed=4 * G * S * Dh * 2)
    return pl.pallas_call(
        _flash_attn_kernel,
        out_shape=jax.ShapeDtypeStruct((G, S, Dh), jnp.bfloat16),
        grid=(G, S // tk),
        in_specs=[
            pl.BlockSpec((1, S, Dh), lambda g, kv: (g, 0, 0)),
            pl.BlockSpec((1, tk, Dh), lambda g, kv: (g, kv, 0)),
            pl.BlockSpec((1, tk, Dh), lambda g, kv: (g, kv, 0)),
        ],
        out_specs=pl.BlockSpec((1, S, Dh), lambda g, kv: (g, 0, 0)),
        scratch_shapes=[
            pltpu.VMEM((S, 1), jnp.float32),     # running max
            pltpu.VMEM((S, 1), jnp.float32),     # running denom
            pltpu.VMEM((S, Dh), jnp.float32),    # running numerator
        ],
        compiler_params=_compiler_params("parallel", "arbitrary"),
        cost_estimate=cost,
    )(q, k, v)


# ----------------- output projection + residual + LayerNorm -----------------

def _linear_residual_ln_kernel(x_ref, w_ref, b_ref, res_ref, g_ref, be_ref, o_ref):
    x = x_ref[...].astype(jnp.bfloat16)
    y = jnp.dot(x, w_ref[...], preferred_element_type=jnp.float32)
    y = y + b_ref[...] + res_ref[...]
    d_inv = 1.0 / y.shape[-1]
    mean = jnp.sum(y, axis=-1, keepdims=True) * d_inv          # one-pass LN stats
    var = jnp.sum(y * y, axis=-1, keepdims=True) * d_inv - mean * mean
    o_ref[...] = (y - mean) * jax.lax.rsqrt(var + LN_EPS) * g_ref[...] + be_ref[...]


def linear_residual_layernorm(x2d, w_t, b, res2d, gamma, beta, *, row_tile=1024):
    M, Din = x2d.shape
    Dout = w_t.shape[1]
    tm = min(M, row_tile)
    cost = pl.CostEstimate(
        flops=2 * M * Din * Dout + 10 * M * Dout,
        transcendentals=M,
        bytes_accessed=(M * Din * x2d.dtype.itemsize + Din * Dout * 2
                        + 2 * M * Dout * 4 + 3 * Dout * 4))
    return pl.pallas_call(
        _linear_residual_ln_kernel,
        out_shape=jax.ShapeDtypeStruct((M, Dout), jnp.float32),
        grid=(pl.cdiv(M, tm),),
        in_specs=[
            pl.BlockSpec((tm, Din), lambda i: (i, 0)),
            pl.BlockSpec((Din, Dout), lambda i: (0, 0)),    # resident bf16 weight
            pl.BlockSpec((1, Dout), lambda i: (0, 0)),
            pl.BlockSpec((tm, Dout), lambda i: (i, 0)),
            pl.BlockSpec((1, Dout), lambda i: (0, 0)),
            pl.BlockSpec((1, Dout), lambda i: (0, 0)),
        ],
        out_specs=pl.BlockSpec((tm, Dout), lambda i: (i, 0)),
        compiler_params=_compiler_params("parallel"),
        cost_estimate=cost,
    )(x2d, w_t, b.reshape(1, Dout), res2d,
      gamma.reshape(1, Dout), beta.reshape(1, Dout))


# --------------- fused FFN: fc1 + ReLU + fc2 + residual + LN ---------------

def _ffn_kernel(x_ref, w1_ref, b1_ref, w2_ref, b2_ref, g_ref, be_ref,
                o_ref, acc_ref):
    kc = pl.program_id(1)

    @pl.when(kc == 0)
    def _():
        acc_ref[...] = jnp.zeros(acc_ref.shape, acc_ref.dtype)

    xb = x_ref[...].astype(jnp.bfloat16)
    h = jnp.dot(xb, w1_ref[...], preferred_element_type=jnp.float32) + b1_ref[...]
    h = jnp.maximum(h, 0.0).astype(jnp.bfloat16)            # hidden chunk never hits HBM
    acc_ref[...] += jnp.dot(h, w2_ref[...], preferred_element_type=jnp.float32)

    @pl.when(kc == pl.num_programs(1) - 1)
    def _():
        y = acc_ref[...] + b2_ref[...] + x_ref[...]         # residual = FFN input
        d_inv = 1.0 / y.shape[-1]
        mean = jnp.sum(y, axis=-1, keepdims=True) * d_inv
        var = jnp.sum(y * y, axis=-1, keepdims=True) * d_inv - mean * mean
        o_ref[...] = (y - mean) * jax.lax.rsqrt(var + LN_EPS) * g_ref[...] + be_ref[...]


def ffn_residual_layernorm(x2d, w1_t, b1, w2_t, b2, gamma, beta,
                           *, row_tile=1024, hidden_tile=512):
    M, D = x2d.shape
    H = w1_t.shape[1]
    tm = min(M, row_tile)
    th = min(H, hidden_tile)
    if H % th:
        th = H   # TODO(synk): support ragged hidden chunks via masking
    cost = pl.CostEstimate(
        flops=4 * M * D * H + 10 * M * D,
        transcendentals=M,
        bytes_accessed=2 * M * D * 4 + 2 * D * H * 2 + (H + 3 * D) * 4)
    return pl.pallas_call(
        _ffn_kernel,
        out_shape=jax.ShapeDtypeStruct((M, D), jnp.float32),
        grid=(pl.cdiv(M, tm), H // th),
        in_specs=[
            pl.BlockSpec((tm, D), lambda i, k: (i, 0)),
            pl.BlockSpec((D, th), lambda i, k: (0, k)),
            pl.BlockSpec((1, th), lambda i, k: (0, k)),
            pl.BlockSpec((th, D), lambda i, k: (k, 0)),
            pl.BlockSpec((1, D), lambda i, k: (0, 0)),
            pl.BlockSpec((1, D), lambda i, k: (0, 0)),
            pl.BlockSpec((1, D), lambda i, k: (0, 0)),
        ],
        out_specs=pl.BlockSpec((tm, D), lambda i, k: (i, 0)),
        scratch_shapes=[pltpu.VMEM((tm, D), jnp.float32)],
        compiler_params=_compiler_params("parallel", "arbitrary"),
        cost_estimate=cost,
    )(x2d, w1_t, b1.reshape(1, H), w2_t, b2.reshape(1, D),
      gamma.reshape(1, D), beta.reshape(1, D))


# --------------------------- Encoder forward pass ---------------------------

def encoder_forward(x, params, num_head):
    """x: (B, S, D) float32."""
    B, S, D = x.shape
    dim_head = D // num_head
    x2d = x.reshape(B * S, D)

    # ---- Multi-Head Attention ----
    # Fused Q/K/V projection: three bf16 outputs, no XLA-side slicing.
    q, k, v = qkv_projection(x2d, params["w_qkv_t"], params["b_qkv"])

    # Replicate torch .view(B*num_head, -1, dim_head): contiguous reshape only.
    qh = q.reshape(B * num_head, S, dim_head)
    kh = k.reshape(B * num_head, S, dim_head)
    vh = v.reshape(B * num_head, S, dim_head)

    ctx = flash_attention(qh, kh, vh)                        # (B*H, S, Dh) bf16
    ctx2d = ctx.reshape(B * S, D)                            # torch .view(B,-1,H*Dh)

    # Output projection + residual + LayerNorm fused (dropout p=0 -> identity).
    mha_out = linear_residual_layernorm(
        ctx2d, params["wo_t"], params["bo"], x2d,
        params["ln1_g"], params["ln1_b"])

    # ---- Position-wise Feed Forward (fully fused, hidden stays in VMEM) ----
    out = ffn_residual_layernorm(
        mha_out, params["w1_t"], params["b1"], params["w2_t"], params["b2"],
        params["ln2_g"], params["ln2_b"])

    return out.reshape(B, S, D)


# ------------------------------ Param init ------------------------------

def init_params(key, dim_model, num_head, hidden):
    def lin_init(k, dout, din):
        # torch nn.Linear default init: U(-1/sqrt(din), 1/sqrt(din)) on (dout, din)
        k1, k2 = jax.random.split(k)
        bound = 1.0 / math.sqrt(din)
        w = jax.random.uniform(k1, (dout, din), jnp.float32, -bound, bound)
        b = jax.random.uniform(k2, (dout,), jnp.float32, -bound, bound)
        return w, b

    keys = jax.random.split(key, 6)
    wq, bq = lin_init(keys[0], dim_model, dim_model)
    wk, bk = lin_init(keys[1], dim_model, dim_model)
    wv, bv = lin_init(keys[2], dim_model, dim_model)
    wo, bo = lin_init(keys[3], dim_model, dim_model)
    w1, b1 = lin_init(keys[4], hidden, dim_model)
    w2, b2 = lin_init(keys[5], dim_model, hidden)

    # Fold 1/sqrt(dim_head) into W_q / b_q: (Q*scale) @ K^T == (Q @ K^T) * scale.
    scale = (dim_model // num_head) ** (-0.5)
    wq = wq * scale
    bq = bq * scale

    # Layout plumbing: pre-transpose to (Din, Dout) and stack Q/K/V weights.
    # Matmul operands stored bf16 (MXU-native); biases / LN params stay f32.
    w_qkv_t = jnp.stack([wq.T, wk.T, wv.T], axis=0).astype(jnp.bfloat16)  # (3,D,D)
    b_qkv = jnp.stack([bq, bk, bv], axis=0).reshape(3, 1, dim_model)      # (3,1,D)

    return dict(
        w_qkv_t=w_qkv_t, b_qkv=b_qkv,
        wo_t=wo.T.astype(jnp.bfloat16), bo=bo,
        w1_t=w1.T.astype(jnp.bfloat16), b1=b1,
        w2_t=w2.T.astype(jnp.bfloat16), b2=b2,
        ln1_g=jnp.ones((dim_model,), jnp.float32),
        ln1_b=jnp.zeros((dim_model,), jnp.float32),
        ln2_g=jnp.ones((dim_model,), jnp.float32),
        ln2_b=jnp.zeros((dim_model,), jnp.float32),
    )


# --------------------------------- main ---------------------------------

if __name__ == "__main__":
    dim_model = 32
    num_head = 4
    hidden = 64
    batch = 2
    seq = 8

    key = jax.random.PRNGKey(0)
    k_x, k_p = jax.random.split(key)
    x = jax.random.normal(k_x, (batch, seq, dim_model), dtype=jnp.float32)
    params = init_params(k_p, dim_model, num_head, hidden)

    fwd = jax.jit(functools.partial(encoder_forward, num_head=num_head))
    out = fwd(x, params)
    jax.block_until_ready(out)
    assert out.shape == (batch, seq, dim_model)
    assert bool(jnp.all(jnp.isfinite(out)))
    print("KERNEL_OK")
</pallas_src>

<mosaic_0001>
module attributes {stable_mosaic.version = 11 : i64} {
  func.func @_flash_attn_kernel(%arg0: i32, %arg1: i32, %arg2: memref<1x8x8xbf16, #tpu.memory_space<vmem>>, %arg3: memref<1x8x8xbf16, #tpu.memory_space<vmem>>, %arg4: memref<1x8x8xbf16, #tpu.memory_space<vmem>>, %arg5: memref<1x8x8xbf16, #tpu.memory_space<vmem>>, %arg6: memref<8x1xf32, #tpu.memory_space<vmem>>, %arg7: memref<8x1xf32, #tpu.memory_space<vmem>>, %arg8: memref<8x8xf32, #tpu.memory_space<vmem>>) attributes {dimension_semantics = [#tpu.dimension_semantics<parallel>, #tpu.dimension_semantics<arbitrary>], iteration_bounds = array<i64: 8, 1>, scalar_prefetch = 0 : i64, scratch_operands = 3 : i64, tpu.core_type = #tpu.core_type<tc>, window_params = [{transform_indices = @transform_0, window_bounds = array<i64: 1, 8, 8>}, {transform_indices = @transform_1, window_bounds = array<i64: 1, 8, 8>}, {transform_indices = @transform_2, window_bounds = array<i64: 1, 8, 8>}, {transform_indices = @transform_3, window_bounds = array<i64: 1, 8, 8>}]} {
    %c0_i32 = arith.constant 0 : i32
    %0 = arith.cmpi eq, %arg1, %c0_i32 : i32
    %1 = arith.extui %0 : i1 to i32
    %c0_i32_0 = arith.constant 0 : i32
    %2 = arith.cmpi ne, %1, %c0_i32_0 : i32
    scf.if %2 {
      %cst_28 = arith.constant 0xFF800000 : f32
      %37 = vector.broadcast %cst_28 : f32 to vector<8x1xf32>
      %c0_29 = arith.constant 0 : index
      %c0_30 = arith.constant 0 : index
      %38 = vector.load %arg6[%c0_29, %c0_30] : memref<8x1xf32, #tpu.memory_space<vmem>>, vector<8x1xf32>
      tpu.vector_store %arg6[%c0_29, %c0_30], %37 {strides = array<i32>} : memref<8x1xf32, #tpu.memory_space<vmem>>, vector<8x1xf32>,
      %cst_31 = arith.constant 0.000000e+00 : f32
      %39 = vector.broadcast %cst_31 : f32 to vector<8x1xf32>
      %c0_32 = arith.constant 0 : index
      %c0_33 = arith.constant 0 : index
      %40 = vector.load %arg7[%c0_32, %c0_33] : memref<8x1xf32, #tpu.memory_space<vmem>>, vector<8x1xf32>
      tpu.vector_store %arg7[%c0_32, %c0_33], %39 {strides = array<i32>} : memref<8x1xf32, #tpu.memory_space<vmem>>, vector<8x1xf32>,
      %cst_34 = arith.constant 0.000000e+00 : f32
      %41 = vector.broadcast %cst_34 : f32 to vector<8x8xf32>
      %c0_35 = arith.constant 0 : index
      %c0_36 = arith.constant 0 : index
      %42 = vector.load %arg8[%c0_35, %c0_36] : memref<8x8xf32, #tpu.memory_space<vmem>>, vector<8x8xf32>
      tpu.vector_store %arg8[%c0_35, %c0_36], %41 {strides = array<i32>} : memref<8x8xf32, #tpu.memory_space<vmem>>, vector<8x8xf32>,
    } else {
    }
    %c0 = arith.constant 0 : index
    %c0_1 = arith.constant 0 : index
    %c0_2 = arith.constant 0 : index
    %3 = vector.load %arg2[%c0, %c0_1, %c0_2] : memref<1x8x8xbf16, #tpu.memory_space<vmem>>, vector<1x8x8xbf16>
    %4 = vector.shape_cast %3 : vector<1x8x8xbf16> to vector<8x8xbf16>
    %c0_3 = arith.constant 0 : index
    %c0_4 = arith.constant 0 : index
    %c0_5 = arith.constant 0 : index
    %5 = vector.load %arg3[%c0_3, %c0_4, %c0_5] : memref<1x8x8xbf16, #tpu.memory_space<vmem>>, vector<1x8x8xbf16>
    %6 = vector.shape_cast %5 : vector<1x8x8xbf16> to vector<8x8xbf16>
    %c0_6 = arith.constant 0 : index
    %c0_7 = arith.constant 0 : index
    %c0_8 = arith.constant 0 : index
    %7 = vector.load %arg4[%c0_6, %c0_7, %c0_8] : memref<1x8x8xbf16, #tpu.memory_space<vmem>>, vector<1x8x8xbf16>
    %8 = vector.shape_cast %7 : vector<1x8x8xbf16> to vector<8x8xbf16>
    %cst = arith.constant dense<0.000000e+00> : vector<8x8xf32>
    %9 = tpu.matmul %4, %6, %cst {dimension_numbers = #tpu.dot_dimension_numbers<[1], [1], [0], [0], [0, 0, 1, 0], [], []>} : vector<8x8xbf16>, vector<8x8xbf16>, vector<8x8xf32> -> vector<8x8xf32>
    %c0_9 = arith.constant 0 : index
    %c0_10 = arith.constant 0 : index
    %10 = vector.load %arg6[%c0_9, %c0_10] : memref<8x1xf32, #tpu.memory_space<vmem>>, vector<8x1xf32>
    %cst_11 = arith.constant dense<0xFF800000> : vector<8xf32>
    %11 = vector.multi_reduction <maximumf>, %9, %cst_11 [1] : vector<8x8xf32> to vector<8xf32>
    %12 = vector.shape_cast %11 : vector<8xf32> to vector<8x1xf32>
    %13 = arith.maximumf %10, %12 : vector<8x1xf32>
    %c0_12 = arith.constant 0 : index
    %c0_13 = arith.constant 0 : index
    %14 = vector.load %arg6[%c0_12, %c0_13] : memref<8x1xf32, #tpu.memory_space<vmem>>, vector<8x1xf32>
    %15 = arith.subf %14, %13 : vector<8x1xf32>
    %16 = math.exp %15 : vector<8x1xf32>
    %17 = vector.broadcast %13 : vector<8x1xf32> to vector<8x8xf32>
    %18 = arith.subf %9, %17 : vector<8x8xf32>
    %19 = math.exp %18 : vector<8x8xf32>
    %c0_14 = arith.constant 0 : index
    %c0_15 = arith.constant 0 : index
    %20 = vector.load %arg7[%c0_14, %c0_15] : memref<8x1xf32, #tpu.memory_space<vmem>>, vector<8x1xf32>
    %21 = arith.mulf %16, %20 : vector<8x1xf32>
    %cst_16 = arith.constant dense<0.000000e+00> : vector<8xf32>
    %22 = vector.multi_reduction <add>, %19, %cst_16 [1] : vector<8x8xf32> to vector<8xf32>
    %23 = vector.shape_cast %22 : vector<8xf32> to vector<8x1xf32>
    %24 = arith.addf %21, %23 : vector<8x1xf32>
    %c0_17 = arith.constant 0 : index
    %c0_18 = arith.constant 0 : index
    %25 = vector.load %arg7[%c0_17, %c0_18] : memref<8x1xf32, #tpu.memory_space<vmem>>, vector<8x1xf32>
    tpu.vector_store %arg7[%c0_17, %c0_18], %24 {strides = array<i32>} : memref<8x1xf32, #tpu.memory_space<vmem>>, vector<8x1xf32>,
    %c0_19 = arith.constant 0 : index
    %c0_20 = arith.constant 0 : index
    %26 = vector.load %arg8[%c0_19, %c0_20] : memref<8x8xf32, #tpu.memory_space<vmem>>, vector<8x8xf32>
    %27 = vector.broadcast %16 : vector<8x1xf32> to vector<8x8xf32>
    %28 = arith.mulf %27, %26 : vector<8x8xf32>
    %29 = arith.truncf %19 : vector<8x8xf32> to vector<8x8xbf16>
    %cst_21 = arith.constant dense<0.000000e+00> : vector<8x8xf32>
    %30 = tpu.matmul %29, %8, %cst_21 {dimension_numbers = #tpu.dot_dimension_numbers<[1], [0], [0], [1], [0, 0, 1, 1], [], []>} : vector<8x8xbf16>, vector<8x8xbf16>, vector<8x8xf32> -> vector<8x8xf32>
    %31 = arith.addf %28, %30 : vector<8x8xf32>
    %c0_22 = arith.constant 0 : index
    %c0_23 = arith.constant 0 : index
    %32 = vector.load %arg8[%c0_22, %c0_23] : memref<8x8xf32, #tpu.memory_space<vmem>>, vector<8x8xf32>
    tpu.vector_store %arg8[%c0_22, %c0_23], %31 {strides = array<i32>} : memref<8x8xf32, #tpu.memory_space<vmem>>, vector<8x8xf32>,
    %c0_24 = arith.constant 0 : index
    %c0_25 = arith.constant 0 : index
    %33 = vector.load %arg6[%c0_24, %c0_25] : memref<8x1xf32, #tpu.memory_space<vmem>>, vector<8x1xf32>
    tpu.vector_store %arg6[%c0_24, %c0_25], %13 {strides = array<i32>} : memref<8x1xf32, #tpu.memory_space<vmem>>, vector<8x1xf32>,
    %c0_i32_26 = arith.constant 0 : i32
    %34 = arith.cmpi eq, %arg1, %c0_i32_26 : i32
    %35 = arith.extui %34 : i1 to i32
    %c0_i32_27 = arith.constant 0 : i32
    %36 = arith.cmpi ne, %35, %c0_i32_27 : i32
    scf.if %36 {
      %c0_28 = arith.constant 0 : index
      %c0_29 = arith.constant 0 : index
      %37 = vector.load %arg7[%c0_28, %c0_29] : memref<8x1xf32, #tpu.memory_space<vmem>>, vector<8x1xf32>
      %38 = tpu.reciprocal %37 {approx = true} : vector<8x1xf32> -> vector<8x1xf32>
      %c0_30 = arith.constant 0 : index
      %c0_31 = arith.constant 0 : index
      %39 = vector.load %arg8[%c0_30, %c0_31] : memref<8x8xf32, #tpu.memory_space<vmem>>, vector<8x8xf32>
      %40 = vector.broadcast %38 : vector<8x1xf32> to vector<8x8xf32>
      %41 = arith.mulf %39, %40 : vector<8x8xf32>
      %42 = arith.truncf %41 : vector<8x8xf32> to vector<8x8xbf16>
      %c0_32 = arith.constant 0 : index
      %c0_33 = arith.constant 0 : index
      %c0_34 = arith.constant 0 : index
      %43 = vector.load %arg5[%c0_32, %c0_33, %c0_34] : memref<1x8x8xbf16, #tpu.memory_space<vmem>>, vector<1x8x8xbf16>
      %44 = vector.shape_cast %43 : vector<1x8x8xbf16> to vector<8x8xbf16>
      %45 = vector.shape_cast %42 : vector<8x8xbf16> to vector<1x8x8xbf16>
      tpu.vector_store %arg5[%c0_32, %c0_33, %c0_34], %45 {strides = array<i32>} : memref<1x8x8xbf16, #tpu.memory_space<vmem>>, vector<1x8x8xbf16>,
    } else {
    }
    return
  }
  func.func @transform_0(%arg0: i32, %arg1: i32) -> (i32, i32, i32) {
    %c0_i32 = arith.constant 0 : i32
    %c0_i32_0 = arith.constant 0 : i32
    %c0_i32_1 = arith.constant 0 : i32
    return %arg0, %c0_i32, %c0_i32_0 : i32, i32, i32
  }
  func.func @transform_1(%arg0: i32, %arg1: i32) -> (i32, i32, i32) {
    %c0_i32 = arith.constant 0 : i32
    %c0_i32_0 = arith.constant 0 : i32
    return %arg0, %arg1, %c0_i32 : i32, i32, i32
  }
  func.func @transform_2(%arg0: i32, %arg1: i32) -> (i32, i32, i32) {
    %c0_i32 = arith.constant 0 : i32
    %c0_i32_0 = arith.constant 0 : i32
    return %arg0, %arg1, %c0_i32 : i32, i32, i32
  }
  func.func @transform_3(%arg0: i32, %arg1: i32) -> (i32, i32, i32) {
    %c0_i32 = arith.constant 0 : i32
    %c0_i32_0 = arith.constant 0 : i32
    %c0_i32_1 = arith.constant 0 : i32
    return %arg0, %c0_i32, %c0_i32_0 : i32, i32, i32
  }
}

module attributes {stable_mosaic.version = 11 : i64} {
  func.func @_qkv_kernel(%arg0: i32, %arg1: memref<16x32xf32, #tpu.memory_space<vmem>>, %arg2: memref<3x32x32xbf16, #tpu.memory_space<vmem>>, %arg3: memref<3x1x32xf32, #tpu.memory_space<vmem>>, %arg4: memref<16x32xbf16, #tpu.memory_space<vmem>>, %arg5: memref<16x32xbf16, #tpu.memory_space<vmem>>, %arg6: memref<16x32xbf16, #tpu.memory_space<vmem>>) attributes {dimension_semantics = [#tpu.dimension_semantics<parallel>], iteration_bounds = array<i64: 1>, scalar_prefetch = 0 : i64, scratch_operands = 0 : i64, tpu.core_type = #tpu.core_type<tc>, window_params = [{transform_indices = @transform_0, window_bounds = array<i64: 16, 32>}, {pipeline_mode = #tpu.pipeline_mode<synchronous>, transform_indices = @transform_1, window_bounds = array<i64: 3, 32, 32>}, {pipeline_mode = #tpu.pipeline_mode<synchronous>, transform_indices = @transform_2, window_bounds = array<i64: 3, 1, 32>}, {transform_indices = @transform_3, window_bounds = array<i64: 16, 32>}, {transform_indices = @transform_4, window_bounds = array<i64: 16, 32>}, {transform_indices = @transform_5, window_bounds = array<i64: 16, 32>}]} {
    %c0 = arith.constant 0 : index
    %c0_0 = arith.constant 0 : index
    %0 = vector.load %arg1[%c0, %c0_0] : memref<16x32xf32, #tpu.memory_space<vmem>>, vector<16x32xf32>
    %1 = arith.truncf %0 : vector<16x32xf32> to vector<16x32xbf16>
    %c0_1 = arith.constant 0 : index
    %c0_2 = arith.constant 0 : index
    %c0_3 = arith.constant 0 : index
    %2 = vector.load %arg2[%c0_1, %c0_2, %c0_3] : memref<3x32x32xbf16, #tpu.memory_space<vmem>>, vector<1x32x32xbf16>
    %3 = vector.shape_cast %2 : vector<1x32x32xbf16> to vector<32x32xbf16>
    %cst = arith.constant dense<0.000000e+00> : vector<16x32xf32>
    %4 = tpu.matmul %1, %3, %cst {dimension_numbers = #tpu.dot_dimension_numbers<[1], [0], [0], [1], [0, 0, 1, 1], [], []>} : vector<16x32xbf16>, vector<32x32xbf16>, vector<16x32xf32> -> vector<16x32xf32>
    %c0_4 = arith.constant 0 : index
    %c0_5 = arith.constant 0 : index
    %c0_6 = arith.constant 0 : index
    %5 = vector.load %arg3[%c0_4, %c0_5, %c0_6] : memref<3x1x32xf32, #tpu.memory_space<vmem>>, vector<1x1x32xf32>
    %6 = vector.shape_cast %5 : vector<1x1x32xf32> to vector<1x32xf32>
    %7 = vector.broadcast %6 : vector<1x32xf32> to vector<16x32xf32>
    %8 = arith.addf %4, %7 : vector<16x32xf32>
    %9 = arith.truncf %8 : vector<16x32xf32> to vector<16x32xbf16>
    %c0_7 = arith.constant 0 : index
    %c0_8 = arith.constant 0 : index
    %10 = vector.load %arg4[%c0_7, %c0_8] : memref<16x32xbf16, #tpu.memory_space<vmem>>, vector<16x32xbf16>
    tpu.vector_store %arg4[%c0_7, %c0_8], %9 {strides = array<i32>} : memref<16x32xbf16, #tpu.memory_space<vmem>>, vector<16x32xbf16>,
    %c1 = arith.constant 1 : index
    %c0_9 = arith.constant 0 : index
    %c0_10 = arith.constant 0 : index
    %11 = vector.load %arg2[%c1, %c0_9, %c0_10] : memref<3x32x32xbf16, #tpu.memory_space<vmem>>, vector<1x32x32xbf16>
    %12 = vector.shape_cast %11 : vector<1x32x32xbf16> to vector<32x32xbf16>
    %cst_11 = arith.constant dense<0.000000e+00> : vector<16x32xf32>
    %13 = tpu.matmul %1, %12, %cst_11 {dimension_numbers = #tpu.dot_dimension_numbers<[1], [0], [0], [1], [0, 0, 1, 1], [], []>} : vector<16x32xbf16>, vector<32x32xbf16>, vector<16x32xf32> -> vector<16x32xf32>
    %c1_12 = arith.constant 1 : index
    %c0_13 = arith.constant 0 : index
    %c0_14 = arith.constant 0 : index
    %14 = vector.load %arg3[%c1_12, %c0_13, %c0_14] : memref<3x1x32xf32, #tpu.memory_space<vmem>>, vector<1x1x32xf32>
    %15 = vector.shape_cast %14 : vector<1x1x32xf32> to vector<1x32xf32>
    %16 = vector.broadcast %15 : vector<1x32xf32> to vector<16x32xf32>
    %17 = arith.addf %13, %16 : vector<16x32xf32>
    %18 = arith.truncf %17 : vector<16x32xf32> to vector<16x32xbf16>
    %c0_15 = arith.constant 0 : index
    %c0_16 = arith.constant 0 : index
    %19 = vector.load %arg5[%c0_15, %c0_16] : memref<16x32xbf16, #tpu.memory_space<vmem>>, vector<16x32xbf16>
    tpu.vector_store %arg5[%c0_15, %c0_16], %18 {strides = array<i32>} : memref<16x32xbf16, #tpu.memory_space<vmem>>, vector<16x32xbf16>,
    %c2 = arith.constant 2 : index
    %c0_17 = arith.constant 0 : index
    %c0_18 = arith.constant 0 : index
    %20 = vector.load %arg2[%c2, %c0_17, %c0_18] : memref<3x32x32xbf16, #tpu.memory_space<vmem>>, vector<1x32x32xbf16>
    %21 = vector.shape_cast %20 : vector<1x32x32xbf16> to vector<32x32xbf16>
    %cst_19 = arith.constant dense<0.000000e+00> : vector<16x32xf32>
    %22 = tpu.matmul %1, %21, %cst_19 {dimension_numbers = #tpu.dot_dimension_numbers<[1], [0], [0], [1], [0, 0, 1, 1], [], []>} : vector<16x32xbf16>, vector<32x32xbf16>, vector<16x32xf32> -> vector<16x32xf32>
    %c2_20 = arith.constant 2 : index
    %c0_21 = arith.constant 0 : index
    %c0_22 = arith.constant 0 : index
    %23 = vector.load %arg3[%c2_20, %c0_21, %c0_22] : memref<3x1x32xf32, #tpu.memory_space<vmem>>, vector<1x1x32xf32>
    %24 = vector.shape_cast %23 : vector<1x1x32xf32> to vector<1x32xf32>
    %25 = vector.broadcast %24 : vector<1x32xf32> to vector<16x32xf32>
    %26 = arith.addf %22, %25 : vector<16x32xf32>
    %27 = arith.truncf %26 : vector<16x32xf32> to vector<16x32xbf16>
    %c0_23 = arith.constant 0 : index
    %c0_24 = arith.constant 0 : index
    %28 = vector.load %arg6[%c0_23, %c0_24] : memref<16x32xbf16, #tpu.memory_space<vmem>>, vector<16x32xbf16>
    tpu.vector_store %arg6[%c0_23, %c0_24], %27 {strides = array<i32>} : memref<16x32xbf16, #tpu.memory_space<vmem>>, vector<16x32xbf16>,
    return
  }
  func.func @transform_0(%arg0: i32) -> (i32, i32) {
    %c0_i32 = arith.constant 0 : i32
    %c0_i32_0 = arith.constant 0 : i32
    return %arg0, %c0_i32 : i32, i32
  }
  func.func @transform_1(%arg0: i32) -> (i32, i32, i32) {
    %c0_i32 = arith.constant 0 : i32
    %c0_i32_0 = arith.constant 0 : i32
    %c0_i32_1 = arith.constant 0 : i32
    %c0_i32_2 = arith.constant 0 : i32
    return %c0_i32, %c0_i32_0, %c0_i32_1 : i32, i32, i32
  }
  func.func @transform_2(%arg0: i32) -> (i32, i32, i32) {
    %c0_i32 = arith.constant 0 : i32
    %c0_i32_0 = arith.constant 0 : i32
    %c0_i32_1 = arith.constant 0 : i32
    %c0_i32_2 = arith.constant 0 : i32
    return %c0_i32, %c0_i32_0, %c0_i32_1 : i32, i32, i32
  }
  func.func @transform_3(%arg0: i32) -> (i32, i32) {
    %c0_i32 = arith.constant 0 : i32
    %c0_i32_0 = arith.constant 0 : i32
    return %arg0, %c0_i32 : i32, i32
  }
  func.func @transform_4(%arg0: i32) -> (i32, i32) {
    %c0_i32 = arith.constant 0 : i32
    %c0_i32_0 = arith.constant 0 : i32
    return %arg0, %c0_i32 : i32, i32
  }
  func.func @transform_5(%arg0: i32) -> (i32, i32) {
    %c0_i32 = arith.constant 0 : i32
    %c0_i32_0 = arith.constant 0 : i32
    return %arg0, %c0_i32 : i32, i32
  }
}

module attributes {stable_mosaic.version = 11 : i64} {
  func.func @_linear_residual_ln_kernel(%arg0: i32, %arg1: memref<16x32xbf16, #tpu.memory_space<vmem>>, %arg2: memref<32x32xbf16, #tpu.memory_space<vmem>>, %arg3: memref<1x32xf32, #tpu.memory_space<vmem>>, %arg4: memref<16x32xf32, #tpu.memory_space<vmem>>, %arg5: memref<1x32xf32, #tpu.memory_space<vmem>>, %arg6: memref<1x32xf32, #tpu.memory_space<vmem>>, %arg7: memref<16x32xf32, #tpu.memory_space<vmem>>) attributes {dimension_semantics = [#tpu.dimension_semantics<parallel>], iteration_bounds = array<i64: 1>, scalar_prefetch = 0 : i64, scratch_operands = 0 : i64, tpu.core_type = #tpu.core_type<tc>, window_params = [{transform_indices = @transform_0, window_bounds = array<i64: 16, 32>}, {pipeline_mode = #tpu.pipeline_mode<synchronous>, transform_indices = @transform_1, window_bounds = array<i64: 32, 32>}, {pipeline_mode = #tpu.pipeline_mode<synchronous>, transform_indices = @transform_2, window_bounds = array<i64: 1, 32>}, {transform_indices = @transform_3, window_bounds = array<i64: 16, 32>}, {pipeline_mode = #tpu.pipeline_mode<synchronous>, transform_indices = @transform_4, window_bounds = array<i64: 1, 32>}, {pipeline_mode = #tpu.pipeline_mode<synchronous>, transform_indices = @transform_5, window_bounds = array<i64: 1, 32>}, {transform_indices = @transform_6, window_bounds = array<i64: 16, 32>}]} {
    %c0 = arith.constant 0 : index
    %c0_0 = arith.constant 0 : index
    %0 = vector.load %arg1[%c0, %c0_0] : memref<16x32xbf16, #tpu.memory_space<vmem>>, vector<16x32xbf16>
    %c0_1 = arith.constant 0 : index
    %c0_2 = arith.constant 0 : index
    %1 = vector.load %arg2[%c0_1, %c0_2] : memref<32x32xbf16, #tpu.memory_space<vmem>>, vector<32x32xbf16>
    %cst = arith.constant dense<0.000000e+00> : vector<16x32xf32>
    %2 = tpu.matmul %0, %1, %cst {dimension_numbers = #tpu.dot_dimension_numbers<[1], [0], [0], [1], [0, 0, 1, 1], [], []>} : vector<16x32xbf16>, vector<32x32xbf16>, vector<16x32xf32> -> vector<16x32xf32>
    %c0_3 = arith.constant 0 : index
    %c0_4 = arith.constant 0 : index
    %3 = vector.load %arg3[%c0_3, %c0_4] : memref<1x32xf32, #tpu.memory_space<vmem>>, vector<1x32xf32>
    %4 = vector.broadcast %3 : vector<1x32xf32> to vector<16x32xf32>
    %5 = arith.addf %2, %4 : vector<16x32xf32>
    %c0_5 = arith.constant 0 : index
    %c0_6 = arith.constant 0 : index
    %6 = vector.load %arg4[%c0_5, %c0_6] : memref<16x32xf32, #tpu.memory_space<vmem>>, vector<16x32xf32>
    %7 = arith.addf %5, %6 : vector<16x32xf32>
    %cst_7 = arith.constant dense<0.000000e+00> : vector<16xf32>
    %8 = vector.multi_reduction <add>, %7, %cst_7 [1] : vector<16x32xf32> to vector<16xf32>
    %9 = vector.shape_cast %8 : vector<16xf32> to vector<16x1xf32>
    %cst_8 = arith.constant 3.125000e-02 : f32
    %10 = vector.broadcast %cst_8 : f32 to vector<16x1xf32>
    %11 = arith.mulf %9, %10 : vector<16x1xf32>
    %12 = arith.mulf %7, %7 : vector<16x32xf32>
    %cst_9 = arith.constant dense<0.000000e+00> : vector<16xf32>
    %13 = vector.multi_reduction <add>, %12, %cst_9 [1] : vector<16x32xf32> to vector<16xf32>
    %14 = vector.shape_cast %13 : vector<16xf32> to vector<16x1xf32>
    %cst_10 = arith.constant 3.125000e-02 : f32
    %15 = vector.broadcast %cst_10 : f32 to vector<16x1xf32>
    %16 = arith.mulf %14, %15 : vector<16x1xf32>
    %17 = arith.mulf %11, %11 : vector<16x1xf32>
    %18 = arith.subf %16, %17 : vector<16x1xf32>
    %19 = vector.broadcast %11 : vector<16x1xf32> to vector<16x32xf32>
    %20 = arith.subf %7, %19 : vector<16x32xf32>
    %cst_11 = arith.constant 9.99999974E-6 : f32
    %21 = vector.broadcast %cst_11 : f32 to vector<16x1xf32>
    %22 = arith.addf %18, %21 : vector<16x1xf32>
    %23 = math.rsqrt %22 : vector<16x1xf32>
    %24 = vector.broadcast %23 : vector<16x1xf32> to vector<16x32xf32>
    %25 = arith.mulf %20, %24 : vector<16x32xf32>
    %c0_12 = arith.constant 0 : index
    %c0_13 = arith.constant 0 : index
    %26 = vector.load %arg5[%c0_12, %c0_13] : memref<1x32xf32, #tpu.memory_space<vmem>>, vector<1x32xf32>
    %27 = vector.broadcast %26 : vector<1x32xf32> to vector<16x32xf32>
    %28 = arith.mulf %25, %27 : vector<16x32xf32>
    %c0_14 = arith.constant 0 : index
    %c0_15 = arith.constant 0 : index
    %29 = vector.load %arg6[%c0_14, %c0_15] : memref<1x32xf32, #tpu.memory_space<vmem>>, vector<1x32xf32>
    %30 = vector.broadcast %29 : vector<1x32xf32> to vector<16x32xf32>
    %31 = arith.addf %28, %30 : vector<16x32xf32>
    %c0_16 = arith.constant 0 : index
    %c0_17 = arith.constant 0 : index
    %32 = vector.load %arg7[%c0_16, %c0_17] : memref<16x32xf32, #tpu.memory_space<vmem>>, vector<16x32xf32>
    tpu.vector_store %arg7[%c0_16, %c0_17], %31 {strides = array<i32>} : memref<16x32xf32, #tpu.memory_space<vmem>>, vector<16x32xf32>,
    return
  }
  func.func @transform_0(%arg0: i32) -> (i32, i32) {
    %c0_i32 = arith.constant 0 : i32
    %c0_i32_0 = arith.constant 0 : i32
    return %arg0, %c0_i32 : i32, i32
  }
  func.func @transform_1(%arg0: i32) -> (i32, i32) {
    %c0_i32 = arith.constant 0 : i32
    %c0_i32_0 = arith.constant 0 : i32
    %c0_i32_1 = arith.constant 0 : i32
    return %c0_i32, %c0_i32_0 : i32, i32
  }
  func.func @transform_2(%arg0: i32) -> (i32, i32) {
    %c0_i32 = arith.constant 0 : i32
    %c0_i32_0 = arith.constant 0 : i32
    %c0_i32_1 = arith.constant 0 : i32
    return %c0_i32, %c0_i32_0 : i32, i32
  }
  func.func @transform_3(%arg0: i32) -> (i32, i32) {
    %c0_i32 = arith.constant 0 : i32
    %c0_i32_0 = arith.constant 0 : i32
    return %arg0, %c0_i32 : i32, i32
  }
  func.func @transform_4(%arg0: i32) -> (i32, i32) {
    %c0_i32 = arith.constant 0 : i32
    %c0_i32_0 = arith.constant 0 : i32
    %c0_i32_1 = arith.constant 0 : i32
    return %c0_i32, %c0_i32_0 : i32, i32
  }
  func.func @transform_5(%arg0: i32) -> (i32, i32) {
    %c0_i32 = arith.constant 0 : i32
    %c0_i32_0 = arith.constant 0 : i32
    %c0_i32_1 = arith.constant 0 : i32
    return %c0_i32, %c0_i32_0 : i32, i32
  }
  func.func @transform_6(%arg0: i32) -> (i32, i32) {
    %c0_i32 = arith.constant 0 : i32
    %c0_i32_0 = arith.constant 0 : i32
    return %arg0, %c0_i32 : i32, i32
  }
}

module attributes {stable_mosaic.version = 11 : i64} {
  func.func @_ffn_kernel(%arg0: i32, %arg1: i32, %arg2: memref<16x32xf32, #tpu.memory_space<vmem>>, %arg3: memref<32x64xbf16, #tpu.memory_space<vmem>>, %arg4: memref<1x64xf32, #tpu.memory_space<vmem>>, %arg5: memref<64x32xbf16, #tpu.memory_space<vmem>>, %arg6: memref<1x32xf32, #tpu.memory_space<vmem>>, %arg7: memref<1x32xf32, #tpu.memory_space<vmem>>, %arg8: memref<1x32xf32, #tpu.memory_space<vmem>>, %arg9: memref<16x32xf32, #tpu.memory_space<vmem>>, %arg10: memref<16x32xf32, #tpu.memory_space<vmem>>) attributes {dimension_semantics = [#tpu.dimension_semantics<parallel>, #tpu.dimension_semantics<arbitrary>], iteration_bounds = array<i64: 1, 1>, scalar_prefetch = 0 : i64, scratch_operands = 1 : i64, tpu.core_type = #tpu.core_type<tc>, window_params = [{transform_indices = @transform_0, window_bounds = array<i64: 16, 32>}, {transform_indices = @transform_1, window_bounds = array<i64: 32, 64>}, {transform_indices = @transform_2, window_bounds = array<i64: 1, 64>}, {transform_indices = @transform_3, window_bounds = array<i64: 64, 32>}, {pipeline_mode = #tpu.pipeline_mode<synchronous>, transform_indices = @transform_4, window_bounds = array<i64: 1, 32>}, {pipeline_mode = #tpu.pipeline_mode<synchronous>, transform_indices = @transform_5, window_bounds = array<i64: 1, 32>}, {pipeline_mode = #tpu.pipeline_mode<synchronous>, transform_indices = @transform_6, window_bounds = array<i64: 1, 32>}, {transform_indices = @transform_7, window_bounds = array<i64: 16, 32>}]} {
    %c0_i32 = arith.constant 0 : i32
    %0 = arith.cmpi eq, %arg1, %c0_i32 : i32
    %1 = arith.extui %0 : i1 to i32
    %c0_i32_0 = arith.constant 0 : i32
    %2 = arith.cmpi ne, %1, %c0_i32_0 : i32
    scf.if %2 {
      %cst_16 = arith.constant 0.000000e+00 : f32
      %21 = vector.broadcast %cst_16 : f32 to vector<16x32xf32>
      %c0_17 = arith.constant 0 : index
      %c0_18 = arith.constant 0 : index
      %22 = vector.load %arg10[%c0_17, %c0_18] : memref<16x32xf32, #tpu.memory_space<vmem>>, vector<16x32xf32>
      tpu.vector_store %arg10[%c0_17, %c0_18], %21 {strides = array<i32>} : memref<16x32xf32, #tpu.memory_space<vmem>>, vector<16x32xf32>,
    } else {
    }
    %c0 = arith.constant 0 : index
    %c0_1 = arith.constant 0 : index
    %3 = vector.load %arg2[%c0, %c0_1] : memref<16x32xf32, #tpu.memory_space<vmem>>, vector<16x32xf32>
    %4 = arith.truncf %3 : vector<16x32xf32> to vector<16x32xbf16>
    %c0_2 = arith.constant 0 : index
    %c0_3 = arith.constant 0 : index
    %5 = vector.load %arg3[%c0_2, %c0_3] : memref<32x64xbf16, #tpu.memory_space<vmem>>, vector<32x64xbf16>
    %cst = arith.constant dense<0.000000e+00> : vector<16x64xf32>
    %6 = tpu.matmul %4, %5, %cst {dimension_numbers = #tpu.dot_dimension_numbers<[1], [0], [0], [1], [0, 0, 1, 1], [], []>} : vector<16x32xbf16>, vector<32x64xbf16>, vector<16x64xf32> -> vector<16x64xf32>
    %c0_4 = arith.constant 0 : index
    %c0_5 = arith.constant 0 : index
    %7 = vector.load %arg4[%c0_4, %c0_5] : memref<1x64xf32, #tpu.memory_space<vmem>>, vector<1x64xf32>
    %8 = vector.broadcast %7 : vector<1x64xf32> to vector<16x64xf32>
    %9 = arith.addf %6, %8 : vector<16x64xf32>
    %cst_6 = arith.constant 0.000000e+00 : f32
    %10 = vector.broadcast %cst_6 : f32 to vector<16x64xf32>
    %11 = arith.maximumf %9, %10 : vector<16x64xf32>
    %12 = arith.truncf %11 : vector<16x64xf32> to vector<16x64xbf16>
    %c0_7 = arith.constant 0 : index
    %c0_8 = arith.constant 0 : index
    %13 = vector.load %arg10[%c0_7, %c0_8] : memref<16x32xf32, #tpu.memory_space<vmem>>, vector<16x32xf32>
    %c0_9 = arith.constant 0 : index
    %c0_10 = arith.constant 0 : index
    %14 = vector.load %arg5[%c0_9, %c0_10] : memref<64x32xbf16, #tpu.memory_space<vmem>>, vector<64x32xbf16>
    %cst_11 = arith.constant dense<0.000000e+00> : vector<16x32xf32>
    %15 = tpu.matmul %12, %14, %cst_11 {dimension_numbers = #tpu.dot_dimension_numbers<[1], [0], [0], [1], [0, 0, 1, 1], [], []>} : vector<16x64xbf16>, vector<64x32xbf16>, vector<16x32xf32> -> vector<16x32xf32>
    %16 = arith.addf %13, %15 : vector<16x32xf32>
    %c0_12 = arith.constant 0 : index
    %c0_13 = arith.constant 0 : index
    %17 = vector.load %arg10[%c0_12, %c0_13] : memref<16x32xf32, #tpu.memory_space<vmem>>, vector<16x32xf32>
    tpu.vector_store %arg10[%c0_12, %c0_13], %16 {strides = array<i32>} : memref<16x32xf32, #tpu.memory_space<vmem>>, vector<16x32xf32>,
    %c0_i32_14 = arith.constant 0 : i32
    %18 = arith.cmpi eq, %arg1, %c0_i32_14 : i32
    %19 = arith.extui %18 : i1 to i32
    %c0_i32_15 = arith.constant 0 : i32
    %20 = arith.cmpi ne, %19, %c0_i32_15 : i32
    scf.if %20 {
      %c0_16 = arith.constant 0 : index
      %c0_17 = arith.constant 0 : index
      %21 = vector.load %arg10[%c0_16, %c0_17] : memref<16x32xf32, #tpu.memory_space<vmem>>, vector<16x32xf32>
      %c0_18 = arith.constant 0 : index
      %c0_19 = arith.constant 0 : index
      %22 = vector.load %arg6[%c0_18, %c0_19] : memref<1x32xf32, #tpu.memory_space<vmem>>, vector<1x32xf32>
      %23 = vector.broadcast %22 : vector<1x32xf32> to vector<16x32xf32>
      %24 = arith.addf %21, %23 : vector<16x32xf32>
      %c0_20 = arith.constant 0 : index
      %c0_21 = arith.constant 0 : index
      %25 = vector.load %arg2[%c0_20, %c0_21] : memref<16x32xf32, #tpu.memory_space<vmem>>, vector<16x32xf32>
      %26 = arith.addf %24, %25 : vector<16x32xf32>
      %cst_22 = arith.constant dense<0.000000e+00> : vector<16xf32>
      %27 = vector.multi_reduction <add>, %26, %cst_22 [1] : vector<16x32xf32> to vector<16xf32>
      %28 = vector.shape_cast %27 : vector<16xf32> to vector<16x1xf32>
      %cst_23 = arith.constant 3.125000e-02 : f32
      %29 = vector.broadcast %cst_23 : f32 to vector<16x1xf32>
      %30 = arith.mulf %28, %29 : vector<16x1xf32>
      %31 = arith.mulf %26, %26 : vector<16x32xf32>
      %cst_24 = arith.constant dense<0.000000e+00> : vector<16xf32>
      %32 = vector.multi_reduction <add>, %31, %cst_24 [1] : vector<16x32xf32> to vector<16xf32>
      %33 = vector.shape_cast %32 : vector<16xf32> to vector<16x1xf32>
      %cst_25 = arith.constant 3.125000e-02 : f32
      %34 = vector.broadcast %cst_25 : f32 to vector<16x1xf32>
      %35 = arith.mulf %33, %34 : vector<16x1xf32>
      %36 = arith.mulf %30, %30 : vector<16x1xf32>
      %37 = arith.subf %35, %36 : vector<16x1xf32>
      %38 = vector.broadcast %30 : vector<16x1xf32> to vector<16x32xf32>
      %39 = arith.subf %26, %38 : vector<16x32xf32>
      %cst_26 = arith.constant 9.99999974E-6 : f32
      %40 = vector.broadcast %cst_26 : f32 to vector<16x1xf32>
      %41 = arith.addf %37, %40 : vector<16x1xf32>
      %42 = math.rsqrt %41 : vector<16x1xf32>
      %43 = vector.broadcast %42 : vector<16x1xf32> to vector<16x32xf32>
      %44 = arith.mulf %39, %43 : vector<16x32xf32>
      %c0_27 = arith.constant 0 : index
      %c0_28 = arith.constant 0 : index
      %45 = vector.load %arg7[%c0_27, %c0_28] : memref<1x32xf32, #tpu.memory_space<vmem>>, vector<1x32xf32>
      %46 = vector.broadcast %45 : vector<1x32xf32> to vector<16x32xf32>
      %47 = arith.mulf %44, %46 : vector<16x32xf32>
      %c0_29 = arith.constant 0 : index
      %c0_30 = arith.constant 0 : index
      %48 = vector.load %arg8[%c0_29, %c0_30] : memref<1x32xf32, #tpu.memory_space<vmem>>, vector<1x32xf32>
      %49 = vector.broadcast %48 : vector<1x32xf32> to vector<16x32xf32>
      %50 = arith.addf %47, %49 : vector<16x32xf32>
      %c0_31 = arith.constant 0 : index
      %c0_32 = arith.constant 0 : index
      %51 = vector.load %arg9[%c0_31, %c0_32] : memref<16x32xf32, #tpu.memory_space<vmem>>, vector<16x32xf32>
      tpu.vector_store %arg9[%c0_31, %c0_32], %50 {strides = array<i32>} : memref<16x32xf32, #tpu.memory_space<vmem>>, vector<16x32xf32>,
    } else {
    }
    return
  }
  func.func @transform_0(%arg0: i32, %arg1: i32) -> (i32, i32) {
    %c0_i32 = arith.constant 0 : i32
    %c0_i32_0 = arith.constant 0 : i32
    return %arg0, %c0_i32 : i32, i32
  }
  func.func @transform_1(%arg0: i32, %arg1: i32) -> (i32, i32) {
    %c0_i32 = arith.constant 0 : i32
    %c0_i32_0 = arith.constant 0 : i32
    return %c0_i32, %arg1 : i32, i32
  }
  func.func @transform_2(%arg0: i32, %arg1: i32) -> (i32, i32) {
    %c0_i32 = arith.constant 0 : i32
    %c0_i32_0 = arith.constant 0 : i32
    return %c0_i32, %arg1 : i32, i32
  }
  func.func @transform_3(%arg0: i32, %arg1: i32) -> (i32, i32) {
    %c0_i32 = arith.constant 0 : i32
    %c0_i32_0 = arith.constant 0 : i32
    return %arg1, %c0_i32 : i32, i32
  }
  func.func @transform_4(%arg0: i32, %arg1: i32) -> (i32, i32) {
    %c0_i32 = arith.constant 0 : i32
    %c0_i32_0 = arith.constant 0 : i32
    %c0_i32_1 = arith.constant 0 : i32
    return %c0_i32, %c0_i32_0 : i32, i32
  }
  func.func @transform_5(%arg0: i32, %arg1: i32) -> (i32, i32) {
    %c0_i32 = arith.constant 0 : i32
    %c0_i32_0 = arith.constant 0 : i32
    %c0_i32_1 = arith.constant 0 : i32
    return %c0_i32, %c0_i32_0 : i32, i32
  }
  func.func @transform_6(%arg0: i32, %arg1: i32) -> (i32, i32) {
    %c0_i32 = arith.constant 0 : i32
    %c0_i32_0 = arith.constant 0 : i32
    %c0_i32_1 = arith.constant 0 : i32
    return %c0_i32, %c0_i32_0 : i32, i32
  }
  func.func @transform_7(%arg0: i32, %arg1: i32) -> (i32, i32) {
    %c0_i32 = arith.constant 0 : i32
    %c0_i32_0 = arith.constant 0 : i32
    return %arg0, %c0_i32 : i32, i32
  }
}

</mosaic_0001>

<bundles_post_ra>
// kernel: encoder_forward.5
= control target key start
LH: loop header
LB: loop body
LE: loop exit
PB: predicated region body
PF: predicated region fallthrough
CT: control target
= control target key end

     0   :  { %s595_s12 = smov 0   ;;  %s597_s13 = smov 0   ;;  %s651_s0 = inlined_call_operand.vmem [shape: bf16[8,8,8], index: 0, kind: input, shape index: {}]   ;;  %s652_s1 = inlined_call_operand.vmem [shape: bf16[8,8,8], index: 1, kind: input, shape index: {}]   ;;  %s653_s2 = inlined_call_operand.vmem [shape: bf16[8,8,8], index: 2, kind: input, shape index: {}]   ;;  %s654_s3 = inlined_call_operand.vmem [shape: bf16[8,8,8], index: 3, kind: output, shape index: {}]  }
   0x1   :  { %s599_s14 = smov 0  }
   0x2 LB: > { %s25_s15 = sadd.s32 1, %s565_s13  ;;  %p486_p0 = scmp.ge.s32.totalorder %s569_s14, 1  ;;  %s569_s14 = sphi %s599_s14, %s13_s14   ;;  %s565_s13 = sphi %s597_s13, %s656_s13   ;;  %s561_s12 = sphi %s595_s12, %s655_s12  }
   0x3   : > { %p27_p1 = scmp.ge.s32.totalorder %s25_s15, 8  ;;  %p176_p2 = scmp.lt.s32.totalorder %s569_s14, 9 }
   0x5   : > { %s658_s15 = smov (%p27_p1, %s25_s15), 0  ;;  %p177_p3 = pnand %p486_p0, %p176_p2 }
   0x6   : > { %p212_p4 = scmp.lt.s32.totalorder (!%p177_p3), %s561_s12, 7  ;;  %vm242_vm0 = vcmask (!%p177_p3), 64512   ;;  %v571_v0 = vmov (!%p177_p3), 0.0   ;;  %vm572_vm1 = vmmov (!%p177_p3), 0   ;;  %vm239_vm2 = vcmask (!%p177_p3), 7168  }
   0x7   : > { %180 = sbr.rel (%p177_p3) target bundleno = 823 (0x337), region = 32  ;;  %499 = vmatprep.subr.bf16.mxu0 (!%p177_p3), %v571_v0  ;;  %243 = vst.msk [vmem:[#allocation4] sm:$0xff] (!%p177_p3), %vm242_vm0, %v571_v0  ;;  %501 = vmatprep.mubr.msk.bf16.mxu0 (!%p177_p3), %vm572_vm1, %v571_v0  ;;  %v573_v4 = vmov (!%p177_p3), -inf   ;;  %v574_v10 = vmov (!%p177_p3), 0   ;;  %vm329_vm3 = vcmask (!%p177_p3), 1043456   ;;  %vm389_vm4 = vcmask (!%p177_p3), 60416  }
   0x8   : > { %505 = vmatprep.subr.bf16.mxu1 (!%p177_p3), %v571_v0  ;;  %507 = vmatprep.mubr.msk.bf16.mxu1 (!%p177_p3), %vm572_vm1, %v571_v0  ;;  %240 = vst.msk [vmem:[#allocation2] sm:$0xff] (!%p177_p3), %vm239_vm2, %v573_v4  ;;  %241 = vst.msk [vmem:[#allocation3] sm:$0xff] (!%p177_p3), %vm239_vm2, %v571_v0 }
   0x9   : > { %539 = vset.pattern.permute.xlu0 (!%p177_p3), %v574_v10  ;;  %540 = vset.pattern.permute.xlu1 (!%p177_p3), %v574_v10 }
   0xe   : > { %s660_s12 = smov (!%p212_p4, %s561_s12), 7  ;;  %v318_v31 = vld [vmem:[#allocation4] sm:$0xff] }
   0xf   : > { %s614_s16 = sshll.u32 %s660_s12, 2  ;;  %v294_v11 = vld [vmem:[#allocation2] sm:$0xff]  ;;  %v310_v25 = vld [vmem:[#allocation3] sm:$0xff] }
  0x10   : > { %s222_s19 = scalar_lea.vmem %s652_s1, %s614_s16  ;;  %s215_s22 = scalar_lea.vmem %s651_s0, %s614_s16 }
  0x11   : > { %v245_v1 = vld [vmem:[%s222_s19] sm:$0xf]  ;;  %s229_s25 = scalar_lea.vmem %s653_s2, %s614_s16  ;;  %s233_s28 = scalar_lea.vmem %s654_s3, %s614_s16 }
  0x12   : > { %v252_v2 = vsel %vm242_vm0, %v245_v1, 0  ;;  %v244_v3 = vld [vmem:[%s215_s22] sm:$0xf] }
  0x13   : > { %500 = vmatpush3.bf16.xpose.msra.mxu0 %v252_v2  ;;  %v246_v15 = vld [vmem:[%s229_s25] sm:$0xf] }
  0x14   : > { %v331_v16 = vsel %vm329_vm3, %v246_v15, 0 }
  0x15   : > { %506 = vmatpush3.bf16.msra.mxu1 %v331_v16 }
  0x1a   : > { %502 = vmatmul.mubr.msk.bf16.vlgmr.msra.gmra.mrb[0].mxu0 %vm242_vm0, %v244_v3 }
  0xed   : > { %v288_v5 = vpop.f32.mrb[0].mxu0 }
  0xee   : > { %v503_v6 = vpop.f32.mrb[1].mxu0  ;;  %v295_v7 = vsel %vm242_vm0, %v288_v5, -inf }
  0xef   : > { %296 = vmax.xlane.f32.xlu0 %v295_v7  ;;  %v291_v8 = vpop.f32.mrb[2].mxu0 }
  0xf0   : > { %v504_v9 = vpop.f32.mrb[3].mxu0 }
 0x17c   : > { %v297_v12 = vpop.xlane.xlu0 %296 }
 0x17d   : > { %v298_v13 = vmax.f32 %v294_v11, %v297_v12 }
 0x17f   : > { %v299_v14 = vsub.f32 %v294_v11, %v298_v13  ;;  %375 = vst.msk [vmem:[#allocation2] sm:$0xff] %vm239_vm2, %v298_v13  ;;  %304 = vperm.xlu0 %539, %v298_v13  }
 0x181   : > { %v300_v23 = vmul.f32 1.442695, %v299_v14 }
 0x1fe   : > { %v305_v17 = vpop.permute.xlu0 %304 }
 0x1ff   : > { %v307_v18 = vsub.f32 %v288_v5, %v305_v17 }
 0x201   : > { %v308_v19 = vmul.f32 1.442695, %v307_v18 }
 0x203   : > { %541 = vpow2.f32 %v308_v19 }
 0x204   : > { %543 = vpow2.f32 %v300_v23 }
 0x20d   : > { %v542_v20 = vpop.eup %541 }
 0x20e   : > { %v312_v21 = vsel %vm242_vm0, %v542_v20, 0.0  ;;  %v325_v22 = vpack.c.bf16 %v542_v20, %v542_v20  ;;  %v544_v24 = vpop.eup %543 }
 0x20f   : > { %313 = vadd.xlane.f32.xlu1 %v312_v21  ;;  %v311_v26 = vmul.f32 %v544_v24, %v310_v25 }
 0x210   : > { %508 = vmatmul.mubr.msk.bf16.vlgmr.msra.gmra.mrb[0].mxu1 %vm242_vm0, %v325_v22 }
 0x220   : > { %321 = vperm.xlu1 %540, %v544_v24  }
 0x29c   : > { %v314_v27 = vpop.xlane.xlu1 %313 }
 0x29d   : > { %v315_v28 = vadd.f32 %v314_v27, %v311_v26 }
 0x29f   : > { %317 = vst.msk [vmem:[#allocation3] sm:$0xff] %vm239_vm2, %v315_v28 }
 0x2a0   : > { %v322_v32 = vpop.permute.xlu1 %321 }
 0x2a1   : > { %v324_v33 = vmul.f32 %v322_v32, %v318_v31 }
 0x2a6   : > { %v379_v29 = vld [vmem:[#allocation3] sm:$0xff] }
 0x2a7   : > { %545 = vrcp.f32 %v379_v29 }
 0x2b1   : > { %v546_v30 = vpop.eup %545 }
 0x2b2   : > { %384 = vperm.xlu1 %540, %v546_v30  }
 0x2e3   : > { %v367_v34 = vpop.f32.mrb[0].mxu1 }
 0x2e4   : > { %v373_v35 = vadd.f32 %v367_v34, %v324_v33  ;;  %v509_v36 = vpop.f32.mrb[1].mxu1 }
 0x2e5   : > { %v370_v37 = vpop.f32.mrb[2].mxu1 }
 0x2e6   : > { %374 = vst.msk [vmem:[#allocation4] sm:$0xff] %vm242_vm0, %v373_v35  ;;  %v510_v38 = vpop.f32.mrb[3].mxu1 }
 0x2ed   : > { %v381_v39 = vld [vmem:[#allocation4] sm:$0xff] }
 0x331   : > { %v385_v40 = vpop.permute.xlu1 %384 }
 0x332   : > { %v387_v41 = vmul.f32 %v385_v40, %v381_v39 }
 0x334   : > { %v388_v42 = vpack.c.bf16 %v387_v41, %v387_v41 }
 0x336   : > { %390 = vst.msk [vmem:[%s233_s28] sm:$0xf] %vm389_vm4, %v388_v42 }
 0x337 PF: > { %s13_s14 = sadd.s32 1, %s569_s14   ;;  %s655_s12 = smov %s565_s13 }
 0x338   : > { %p10_p5 = scmp.ge.s32.totalorder %s13_s14, 10   ;;  %s656_s13 = smov %s658_s15 }
 0x33a   :  { %12 = sbr.rel (!%p10_p5) target bundleno = 2 (0x2), region = 76 }

// kernel: encoder_forward.4
= control target key start
LH: loop header
LB: loop body
LE: loop exit
PB: predicated region body
PF: predicated region fallthrough
CT: control target
= control target key end

     0   :  { %v339_v0 = vmov 0.0   ;;  %vm340_vm0 = vmmov 0   ;;  %vm44_vm1 = vcmask 261120   ;;  %vm97_vm2 = vcmask 257024   ;;  %s431_s1 = inlined_call_operand.vmem [shape: bf16[3,32,32], index: 1, kind: input, shape index: {}]   ;;  %s432_s0 = inlined_call_operand.vmem [shape: f32[16,32], index: 0, kind: input, shape index: {}]   ;;  %s433_s2 = inlined_call_operand.vmem [shape: f32[3,1,32], index: 2, kind: input, shape index: {}]   ;;  %s434_s3 = inlined_call_operand.vmem [shape: bf16[16,32], index: 3, kind: output, shape index: {0}]   ;;  %s435_s4 = inlined_call_operand.vmem [shape: bf16[16,32], index: 4, kind: output, shape index: {1}]   ;;  %s436_s5 = inlined_call_operand.vmem [shape: bf16[16,32], index: 5, kind: output, shape index: {2}]  }
   0x1   :  { %307 = vmatprep.subr.bf16.mxu0 %v339_v0  ;;  %v333_v1 = vld [vmem:[%s431_s1] sm:$0xff]   ;;  %315 = vmatprep.subr.bf16.mxu1 %v339_v0  ;;  %v334_v2 = vld [vmem:[%s431_s1 + $0x8] sm:$0xff]   ;;  %v335_v3 = vld [vmem:[%s431_s1 + $0x10] sm:$0xff]  }
   0x2   :  { %311 = vmatprep.mubr.msk.bf16.mxu0 %vm340_vm0, %v339_v0  ;;  %319 = vmatprep.mubr.msk.bf16.mxu1 %vm340_vm0, %v339_v0  ;;  %v18_v4 = vld [vmem:[%s432_s0] sm:$0xff]  ;;  %v19_v5 = vld [vmem:[%s432_s0 + $0x8] sm:$0xff]  ;;  %v337_v7 = vld [vmem:[%s431_s1 + $0x18] sm:$0xff]  }
   0x3   :  { %308 = vmatpush3.bf16.msra.mxu0 %v333_v1  ;;  %316 = vmatpush3.bf16.msra.mxu1 %v335_v3  ;;  %v20_v6 = vpack.c.bf16 %v19_v5, %v18_v4  ;;  %v336_v8 = vld [vmem:[%s431_s1 + $0x20] sm:$0xff]   ;;  %v338_v9 = vld [vmem:[%s431_s1 + $0x28] sm:$0xff]  }
   0x4   :  { %309 = vmatprep.subr.bf16.mxu0 %v339_v0  ;;  %317 = vmatprep.subr.bf16.mxu1 %v339_v0  ;;  %v264_v10 = vld [vmem:[%s433_s2] ss:$0 sm:$0xff]  ;;  %v275_v12 = vld [vmem:[%s433_s2 + $0x1] ss:$0 sm:$0xff]  ;;  %v286_v27 = vld [vmem:[%s433_s2 + $0x2] ss:$0 sm:$0xff] }
   0x7   :  { %310 = vmatpush3.bf16.msra.mxu0 %v334_v2  ;;  %318 = vmatpush3.bf16.msra.mxu1 %v337_v7 }
   0x8   :  { %323 = vmatprep.subr.bf16.mxu0 %v339_v0 }
   0xa   :  { %312 = vmatmul.mubr.msk.bf16.vlgmr.msra.gmra.mrb[0].mxu0 %vm44_vm1, %v20_v6  ;;  %320 = vmatmul.mubr.msk.bf16.vlgmr.msra.gmra.mrb[0].mxu1 %vm44_vm1, %v20_v6 }
   0xb   :  { %324 = vmatpush3.bf16.msra.mxu0 %v336_v8  ;;  %327 = vmatprep.mubr.msk.bf16.mxu0 %vm340_vm0, %v339_v0 }
   0xc   :  { %325 = vmatprep.subr.bf16.mxu0 %v339_v0 }
   0xf   :  { %326 = vmatpush3.bf16.msra.mxu0 %v338_v9 }
  0x12   :  { %328 = vmatmul.mubr.msk.bf16.vlgmr.msra.gmra.mrb[4].mxu0 %vm44_vm1, %v20_v6 }
  0xdd   :  { %v82_v11 = vpop.f32.mrb[0].mxu0  ;;  %v159_v16 = vpop.f32.mrb[0].mxu1 }
  0xde   :  { %v83_v13 = vadd.f32 %v264_v10, %v82_v11  ;;  %v313_v14 = vpop.f32.mrb[1].mxu0  ;;  %v160_v20 = vadd.f32 %v275_v12, %v159_v16  ;;  %v321_v21 = vpop.f32.mrb[1].mxu1 }
  0xdf   :  { %v85_v15 = vpop.f32.mrb[2].mxu0  ;;  %v162_v22 = vpop.f32.mrb[2].mxu1 }
  0xe0   :  { %v292_v17 = vpack.c.bf16 %v83_v13, %v83_v13  ;;  %v86_v18 = vadd.f32 %v264_v10, %v85_v15  ;;  %v314_v19 = vpop.f32.mrb[3].mxu0  ;;  %v294_v24 = vpack.c.bf16 %v160_v20, %v160_v20  ;;  %v163_v25 = vadd.f32 %v275_v12, %v162_v22  ;;  %v322_v26 = vpop.f32.mrb[3].mxu1 }
  0xe2   :  { %98 = vst.msk [vmem:[%s434_s3] sm:$0xf] %vm97_vm2, %v292_v17  ;;  %v293_v23 = vpack.c.bf16 %v86_v18, %v86_v18  ;;  %174 = vst.msk [vmem:[%s435_s4] sm:$0xf] %vm97_vm2, %v294_v24  ;;  %v295_v28 = vpack.c.bf16 %v163_v25, %v163_v25 }
  0xe4   :  { %99 = vst.msk [vmem:[%s434_s3 + $0x4] sm:$0xf] %vm97_vm2, %v293_v23  ;;  %175 = vst.msk [vmem:[%s435_s4 + $0x4] sm:$0xf] %vm97_vm2, %v295_v28 }
  0xe5   :  { %v235_v29 = vpop.f32.mrb[4].mxu0 }
  0xe6   :  { %v236_v30 = vadd.f32 %v286_v27, %v235_v29  ;;  %v329_v31 = vpop.f32.mrb[5].mxu0 }
  0xe7   :  { %v238_v32 = vpop.f32.mrb[6].mxu0 }
  0xe8   :  { %v296_v33 = vpack.c.bf16 %v236_v30, %v236_v30  ;;  %v239_v34 = vadd.f32 %v286_v27, %v238_v32  ;;  %v330_v35 = vpop.f32.mrb[7].mxu0 }
  0xea   :  { %250 = vst.msk [vmem:[%s436_s5] sm:$0xf] %vm97_vm2, %v296_v33  ;;  %v297_v36 = vpack.c.bf16 %v239_v34, %v239_v34 }
  0xec   :  { %251 = vst.msk [vmem:[%s436_s5 + $0x4] sm:$0xf] %vm97_vm2, %v297_v36 }

// kernel: encoder_forward.6
= control target key start
LH: loop header
LB: loop body
LE: loop exit
PB: predicated region body
PF: predicated region fallthrough
CT: control target
= control target key end

     0   :  { %v184_v0 = vmov 0.0   ;;  %vm185_vm0 = vmmov 0   ;;  %vm54_vm1 = vcmask 261120   ;;  %s258_s1 = inlined_call_operand.vmem [shape: bf16[32,32], index: 1, kind: input, shape index: {}]   ;;  %s259_s0 = inlined_call_operand.vmem [shape: bf16[16,32], index: 0, kind: input, shape index: {}]   ;;  %s260_s2 = inlined_call_operand.vmem [shape: f32[1,32], index: 2, kind: input, shape index: {}]   ;;  %s261_s3 = inlined_call_operand.vmem [shape: f32[16,32], index: 3, kind: input, shape index: {}]   ;;  %s262_s4 = inlined_call_operand.vmem [shape: f32[1,32], index: 4, kind: input, shape index: {}]   ;;  %s263_s5 = inlined_call_operand.vmem [shape: f32[1,32], index: 5, kind: input, shape index: {}]   ;;  %s264_s6 = inlined_call_operand.vmem [shape: f32[16,32], index: 6, kind: output, shape index: {}]  }
   0x1   :  { %167 = vmatprep.subr.bf16.mxu0 %v184_v0  ;;  %v177_v1 = vld [vmem:[%s258_s1] sm:$0xff]   ;;  %171 = vmatprep.mubr.msk.bf16.mxu0 %vm185_vm0, %v184_v0  ;;  %v178_v2 = vld [vmem:[%s258_s1 + $0x8] sm:$0xff]  }
   0x2   :  { %168 = vmatpush3.bf16.msra.mxu0 %v177_v1  ;;  %v179_v3 = vld [vmem:[%s259_s0] sm:$0xff]   ;;  %v100_v10 = vld [vmem:[%s261_s3 + $0x8] sm:$0xff] }
   0x3   :  { %169 = vmatprep.subr.bf16.mxu0 %v184_v0  ;;  %v157_v4 = vld [vmem:[%s260_s2] ss:$0 sm:$0xff] }
   0x4   :  { %v99_v6 = vld [vmem:[%s261_s3] sm:$0xff] }
   0x5   :  { %v162_v37 = vld [vmem:[%s262_s4] ss:$0 sm:$0xff] }
   0x6   :  { %170 = vmatpush3.bf16.msra.mxu0 %v178_v2  ;;  %v163_v39 = vld [vmem:[%s263_s5] ss:$0 sm:$0xff] }
   0x9   :  { %172 = vmatmul.mubr.msk.bf16.vlgmr.msra.gmra.mrb[0].mxu0 %vm54_vm1, %v179_v3 }
  0xdc   :  { %v92_v5 = vpop.f32.mrb[0].mxu0 }
  0xdd   :  { %v93_v7 = vadd.f32 %v157_v4, %v92_v5  ;;  %v173_v8 = vpop.f32.mrb[1].mxu0 }
  0xde   :  { %v95_v9 = vpop.f32.mrb[2].mxu0 }
  0xdf   :  { %v101_v11 = vadd.f32 %v99_v6, %v93_v7  ;;  %v96_v12 = vadd.f32 %v157_v4, %v95_v9  ;;  %v174_v13 = vpop.f32.mrb[3].mxu0 }
  0xe1   :  { %v102_v14 = vadd.f32 %v100_v10, %v96_v12  ;;  %v103_v15 = vsel %vm54_vm1, %v101_v11, 0.0  ;;  %v111_v16 = vmul.f32 %v101_v11, %v101_v11 }
  0xe2   :  { %104 = vadd.xlane.f32.xlu0 %v103_v15 }
  0xe3   :  { %v113_v17 = vsel %vm54_vm1, %v111_v16, 0.0  ;;  %v112_v18 = vmul.f32 %v102_v14, %v102_v14  ;;  %v106_v19 = vsel %vm54_vm1, %v102_v14, 0.0 }
  0xe4   :  { %114 = vadd.xlane.f32.xlu1 %v113_v17 }
  0xe5   :  { %v116_v20 = vsel %vm54_vm1, %v112_v18, 0.0 }
  0xe6   :  { %107 = vadd.xlane.f32.xlu0 %v106_v19 }
  0xe8   :  { %117 = vadd.xlane.f32.xlu1 %v116_v20 }
 0x16f   :  { %v105_v21 = vpop.xlane.xlu0 %104 }
 0x170   :  { %v109_v22 = vmul.f32 0.03125, %v105_v21 }
 0x171   :  { %v115_v23 = vpop.xlane.xlu1 %114 }
 0x172   :  { %v121_v24 = vmul.f32 %v109_v22, %v109_v22  ;;  %v119_v25 = vmul.f32 0.03125, %v115_v23  ;;  %v125_v35 = vsub.f32 %v101_v11, %v109_v22 }
 0x173   :  { %v108_v26 = vpop.xlane.xlu0 %107 }
 0x174   :  { %v123_v27 = vsub.f32 %v119_v25, %v121_v24  ;;  %v110_v28 = vmul.f32 0.03125, %v108_v26 }
 0x175   :  { %v118_v29 = vpop.xlane.xlu1 %117 }
 0x176   :  { %v127_v30 = vadd.f32 1e-05, %v123_v27  ;;  %v122_v31 = vmul.f32 %v110_v28, %v110_v28  ;;  %v120_v32 = vmul.f32 0.03125, %v118_v29  ;;  %v126_v41 = vsub.f32 %v102_v14, %v110_v28 }
 0x178   :  { %180 = vrsqrt.f32 %v127_v30  ;;  %v124_v33 = vsub.f32 %v120_v32, %v122_v31 }
 0x17a   :  { %v128_v34 = vadd.f32 1e-05, %v124_v33 }
 0x17c   :  { %182 = vrsqrt.f32 %v128_v34 }
 0x182   :  { %v181_v36 = vpop.eup %180 }
 0x183   :  { %v131_v38 = vmul.f32 %v181_v36, %v125_v35 }
 0x185   :  { %v140_v40 = vmul.f32 %v162_v37, %v131_v38 }
 0x186   :  { %v183_v42 = vpop.eup %182 }
 0x187   :  { %v149_v43 = vadd.f32 %v163_v39, %v140_v40  ;;  %v132_v44 = vmul.f32 %v183_v42, %v126_v41 }
 0x189   :  { %151 = vst.msk [vmem:[%s264_s6] sm:$0xff] %vm54_vm1, %v149_v43  ;;  %v141_v45 = vmul.f32 %v162_v37, %v132_v44 }
 0x18b   :  { %v150_v46 = vadd.f32 %v163_v39, %v141_v45 }
 0x18d   :  { %152 = vst.msk [vmem:[%s264_s6 + $0x8] sm:$0xff] %vm54_vm1, %v150_v46 }

// kernel: encoder_forward.7
= control target key start
LH: loop header
LB: loop body
LE: loop exit
PB: predicated region body
PF: predicated region fallthrough
CT: control target
= control target key end

     0   :  { %v355_v1 = vmov 0.0   ;;  %vm356_vm0 = vmmov 0   ;;  %vm32_vm1 = vcmask 261120   ;;  %s459_s0 = inlined_call_operand.vmem [shape: f32[16,32], index: 0, kind: input, shape index: {}]   ;;  %s460_s1 = inlined_call_operand.vmem [shape: bf16[32,64], index: 1, kind: input, shape index: {}]   ;;  %s461_s2 = inlined_call_operand.vmem [shape: f32[1,64], index: 2, kind: input, shape index: {}]   ;;  %s462_s3 = inlined_call_operand.vmem [shape: bf16[64,32], index: 3, kind: input, shape index: {}]   ;;  %s463_s4 = inlined_call_operand.vmem [shape: f32[1,32], index: 4, kind: input, shape index: {}]   ;;  %s464_s5 = inlined_call_operand.vmem [shape: f32[1,32], index: 5, kind: input, shape index: {}]   ;;  %s465_s6 = inlined_call_operand.vmem [shape: f32[1,32], index: 6, kind: input, shape index: {}]   ;;  %s466_s7 = inlined_call_operand.hbm [shape: f32[16,32], index: 7, kind: output, shape index: {}]  }
   0x1   :  { %v321_v0 = vld [vmem:[%s460_s1] sm:$0xff]   ;;  %296 = vmatprep.subr.bf16.mxu0 %v355_v1  ;;  %v322_v2 = vld [vmem:[%s460_s1 + $0x8] sm:$0xff]   ;;  %304 = vmatprep.subr.bf16.mxu1 %v355_v1  ;;  %33 = vst.msk [vmem:[#allocation2] sm:$0xff] %vm32_vm1, %v355_v1  ;;  %34 = vst.msk [vmem:[#allocation2 + $0x8] sm:$0xff] %vm32_vm1, %v355_v1 }
   0x2   :  { %297 = vmatpush3.bf16.msra.mxu0 %v321_v0  ;;  %300 = vmatprep.mubr.msk.bf16.mxu0 %vm356_vm0, %v355_v1  ;;  %v35_v3 = vld [vmem:[%s459_s0] sm:$0xff]  ;;  %v36_v4 = vld [vmem:[%s459_s0 + $0x8] sm:$0xff] }
   0x3   :  { %298 = vmatprep.subr.bf16.mxu0 %v355_v1  ;;  %v323_v5 = vld [vmem:[%s462_s3] sm:$0xff]   ;;  %312 = vmatprep.mubr.msk.bf16.mxu1 %vm356_vm0, %v355_v1  ;;  %v324_v6 = vld [vmem:[%s462_s3 + $0x8] sm:$0xff]   ;;  %v37_v7 = vpack.c.bf16 %v36_v4, %v35_v3 }
   0x4   :  { %305 = vmatpush3.bf16.msra.mxu1 %v323_v5 }
   0x5   :  { %306 = vmatprep.subr.bf16.mxu1 %v355_v1 }
   0x6   :  { %299 = vmatpush3.bf16.msra.mxu0 %v322_v2 }
   0x7   :  { %12 = vsyncpa [#allocation4], 0  ;;  %v325_v8 = vld [vmem:[%s462_s3 + $0x10] sm:$0xff]   ;;  %v326_v9 = vld [vmem:[%s462_s3 + $0x18] sm:$0xff]   ;;  %vm143_vm2 = vcmask 523264   ;;  %s357_s20 = smov [#allocation3]  }
   0x8   :  { %307 = vmatpush3.bf16.msra.mxu1 %v324_v6  ;;  %v276_v10 = vld [vmem:[%s461_s2] ss:$0 sm:$0xff]  ;;  %v110_v22 = vld [vmem:[#allocation2 + $0x8] sm:$0xff]  ;;  %s265_s21 = sshll.u32 %s357_s20, 4  ;;  %s266_s21 = int_to_ptr.vmem [resolvable:$true] %s265_s21 }
   0x9   :  { %301 = vmatmul.mubr.msk.bf16.vlgmr.msra.gmra.mrb[0].mxu0 %vm32_vm1, %v37_v7  ;;  %308 = vmatprep.subr.bf16.mxu1 %v355_v1  ;;  %v109_v20 = vld [vmem:[#allocation2] sm:$0xff]  ;;  %p336_p1 = scmp.lt.s32.totalorder %s266_s21, %s266_s21 }
   0xa   :  { %v285_v28 = vld [vmem:[%s463_s4] ss:$0 sm:$0xff] }
   0xb   :  { %v286_v57 = vld [vmem:[%s464_s5] ss:$0 sm:$0xff]  ;;  %s331_s5 = scalar_lea.vmem %s266_s21, 256 }
   0xc   :  { %309 = vmatpush3.bf16.msra.mxu1 %v325_v8  ;;  %v287_v59 = vld [vmem:[%s465_s6] ss:$0 sm:$0xff]  ;;  %p332_p0 = scmp.ne.s32.totalorder %s266_s21, %s331_s5  ;;  %p337_p2 = scmp.lt.s32.totalorder %s331_s5, %s331_s5 }
   0xd   :  { %310 = vmatprep.subr.bf16.mxu1 %v355_v1 }
   0xe   :  { %p338_p3 = por %p337_p2, %p336_p1 }
  0x10   :  { %311 = vmatpush3.bf16.msra.mxu1 %v326_v9  ;;  %p339_p4 = pnand %p338_p3, %p332_p0 }
  0xdc   :  { %v99_v11 = vpop.f32.mrb[0].mxu0 }
  0xdd   :  { %v100_v12 = vadd.f32 %v276_v10, %v99_v11  ;;  %v302_v13 = vpop.f32.mrb[1].mxu0 }
  0xde   :  { %v102_v14 = vpop.f32.mrb[2].mxu0 }
  0xdf   :  { %v103_v15 = vadd.f32 %v276_v10, %v102_v14  ;;  %v303_v16 = vpop.f32.mrb[3].mxu0  ;;  %v106_v17 = vmax.f32 %v100_v12, 0.0 }
  0xe1   :  { %v107_v18 = vmax.f32 %v103_v15, 0.0 }
  0xe3   :  { %v108_v19 = vpack.c.bf16 %v107_v18, %v106_v17 }
  0xe5   :  { %313 = vmatmul.mubr.msk.bf16.vlgmr.msra.gmra.mrb[0].mxu1 %vm143_vm2, %v108_v19 }
 0x1b8   :  { %v181_v21 = vpop.f32.mrb[0].mxu1 }
 0x1b9   :  { %v188_v23 = vadd.f32 %v181_v21, %v109_v20  ;;  %v314_v24 = vpop.f32.mrb[1].mxu1 }
 0x1ba   :  { %v184_v25 = vpop.f32.mrb[2].mxu1 }
 0x1bb   :  { %190 = vst.msk [vmem:[#allocation2] sm:$0xff] %vm32_vm1, %v188_v23  ;;  %v189_v26 = vadd.f32 %v184_v25, %v110_v22  ;;  %v315_v27 = vpop.f32.mrb[3].mxu1 }
 0x1bd   :  { %191 = vst.msk [vmem:[#allocation2 + $0x8] sm:$0xff] %vm32_vm1, %v189_v26 }
 0x1c2   :  { %v195_v29 = vld [vmem:[#allocation2] sm:$0xff] }
 0x1c3   :  { %v204_v30 = vadd.f32 %v285_v28, %v195_v29 }
 0x1c4   :  { %v196_v31 = vld [vmem:[#allocation2 + $0x8] sm:$0xff] }
 0x1c5   :  { %v208_v32 = vadd.f32 %v204_v30, %v35_v3  ;;  %v205_v33 = vadd.f32 %v285_v28, %v196_v31 }
 0x1c7   :  { %v210_v34 = vsel %vm32_vm1, %v208_v32, 0.0  ;;  %v218_v35 = vmul.f32 %v208_v32, %v208_v32  ;;  %v209_v36 = vadd.f32 %v205_v33, %v36_v4 }
 0x1c8   :  { %211 = vadd.xlane.f32.xlu0 %v210_v34 }
 0x1c9   :  { %v220_v37 = vsel %vm32_vm1, %v218_v35, 0.0  ;;  %v219_v38 = vmul.f32 %v209_v36, %v209_v36  ;;  %v213_v39 = vsel %vm32_vm1, %v209_v36, 0.0 }
 0x1ca   :  { %221 = vadd.xlane.f32.xlu1 %v220_v37 }
 0x1cb   :  { %v223_v40 = vsel %vm32_vm1, %v219_v38, 0.0 }
 0x1cc   :  { %214 = vadd.xlane.f32.xlu0 %v213_v39 }
 0x1ce   :  { %224 = vadd.xlane.f32.xlu1 %v223_v40 }
 0x255   :  { %v212_v41 = vpop.xlane.xlu0 %211 }
 0x256   :  { %v216_v42 = vmul.f32 0.03125, %v212_v41 }
 0x257   :  { %v222_v43 = vpop.xlane.xlu1 %221 }
 0x258   :  { %v228_v44 = vmul.f32 %v216_v42, %v216_v42  ;;  %v226_v45 = vmul.f32 0.03125, %v222_v43  ;;  %v232_v55 = vsub.f32 %v208_v32, %v216_v42 }
 0x259   :  { %v215_v46 = vpop.xlane.xlu0 %214 }
 0x25a   :  { %v230_v47 = vsub.f32 %v226_v45, %v228_v44  ;;  %v217_v48 = vmul.f32 0.03125, %v215_v46 }
 0x25b   :  { %v225_v49 = vpop.xlane.xlu1 %224 }
 0x25c   :  { %v234_v50 = vadd.f32 1e-05, %v230_v47  ;;  %v229_v51 = vmul.f32 %v217_v48, %v217_v48  ;;  %v227_v52 = vmul.f32 0.03125, %v225_v49  ;;  %v233_v60 = vsub.f32 %v209_v36, %v217_v48 }
 0x25e   :  { %327 = vrsqrt.f32 %v234_v50  ;;  %v231_v53 = vsub.f32 %v227_v52, %v229_v51 }
 0x260   :  { %v235_v54 = vadd.f32 1e-05, %v231_v53 }
 0x262   :  { %329 = vrsqrt.f32 %v235_v54 }
 0x268   :  { %v328_v56 = vpop.eup %327 }
 0x269   :  { %v238_v58 = vmul.f32 %v328_v56, %v232_v55 }
 0x26b   :  { %v247_v61 = vmul.f32 %v286_v57, %v238_v58 }
 0x26c   :  { %v330_v62 = vpop.eup %329 }
 0x26d   :  { %v239_v63 = vmul.f32 %v330_v62, %v233_v60  ;;  %v256_v0 = vadd.f32 %v287_v59, %v247_v61 }
 0x26f   :  { %v248_v1 = vmul.f32 %v286_v57, %v239_v63  ;;  %258 = vst.msk [vmem:[#allocation3] sm:$0xff] %vm32_vm1, %v256_v0 }
 0x271   :  { %v257_v2 = vadd.f32 %v287_v59, %v248_v1 }
 0x273   :  { %259 = vst.msk [vmem:[#allocation3 + $0x8] sm:$0xff] %vm32_vm1, %v257_v2 }
 0x274   :  { %342 = shalt.err (!%p339_p4)
}
 0x275   :  { %s343_s23 = scalar_lea.hbm %s466_s7, 256 }
 0x276   :  { %p344_p5 = scmp.ne.s32.totalorder %s466_s7, %s343_s23  ;;  %p347_p6 = scmp.lt.u32.totalorder %s343_s23, %s466_s7 }
 0x278   :  { %p349_p7 = pnand %p347_p6, %p344_p5 }
 0x27a   :  { %352 = shalt.err (!%p349_p7)
}
 0x27b   :  { %s358_s28 = smov 128   ;;  %s359_s29 = smov 8  }
 0x27c   :  { %271 = dma.vmem_to_hbm [thread:$0]  %s266_s21, 256, %s466_s7, [#allocation4], %s358_s28, %s358_s28, %s359_s29  }
 0x27d   :  { %353 = dma.done.wait [#allocation4], 256  }
 0x27e   :  { %354 = vsyncadd [#allocation4], 4294967040 }
 0x27f   :  { %275 = vsyncpa [#allocation4], 1 }

</bundles_post_ra>
